<compile_context>
chip_gen: v7x
topology: tpu7x:2x2x1
jax: 0.10.0
libtpu: 0.0.40
codegen_flags: <defaults>
</compile_context>

<pallas_src>
import jax
import jax.numpy as jnp
from jax.experimental import pallas as pl
from jax.experimental.pallas import tpu as pltpu

_LANE = 128
_TARGET_BLOCK_BYTES = 2 << 20      # ~2 MiB/block; x2 buffers x (in+out) = 8 MiB
_MIN_BLOCK_ROWS = 512              # >=512-row f32 tiles reach ~85% of HBM roofline
_MIN_PALLAS_ELEMS = 1 << 18        # below ~256K elements, fused XLA jnp wins


# ---------------------------------------------------------------------------
# Kernels
# ---------------------------------------------------------------------------

def _distance_kernel(params_ref, x_ref, o_ref):
    """Elementwise phi(x) = alpha * min(|x|, beta) on one VMEM tile.

    params_ref: (2,) f32 in SMEM -> [alpha, beta].
    Compute natively in bf16/f32 (matches torch's `.type_as(x)` cast of
    alpha/beta); other dtypes are upcast to f32 and cast back on the store.
    """
    x = x_ref[...]
    if x.dtype in (jnp.dtype(jnp.float32), jnp.dtype(jnp.bfloat16)):
        compute_dtype = x.dtype
    else:
        compute_dtype = jnp.dtype(jnp.float32)
        x = x.astype(compute_dtype)
    alpha = params_ref[0].astype(compute_dtype)
    beta = params_ref[1].astype(compute_dtype)
    o_ref[...] = (alpha * jnp.minimum(jnp.abs(x), beta)).astype(o_ref.dtype)


def _distance_matrix_kernel(params_ref, o_ref):
    """Write-only tile of dist[i, l] = alpha * min(|i - l|, beta).

    The index difference is generated in-kernel with broadcasted_iota; both
    grid axes contribute an offset so the matrix is tiled in rows AND columns.
    int32 -> f32 cast of (i - l) is exact for L < 2^24 (any realistic L).
    """
    alpha = params_ref[0]
    beta = params_ref[1]
    bm, bn = o_ref.shape
    row0 = pl.program_id(0) * bm
    col0 = pl.program_id(1) * bn
    i = jax.lax.broadcasted_iota(jnp.int32, (bm, bn), 0) + row0
    l = jax.lax.broadcasted_iota(jnp.int32, (bm, bn), 1) + col0
    diff = (i - l).astype(jnp.float32)
    o_ref[...] = (alpha * jnp.minimum(jnp.abs(diff), beta)).astype(o_ref.dtype)


# ---------------------------------------------------------------------------
# Tiling helpers
# ---------------------------------------------------------------------------

def _pick_block_rows(rows, itemsize):
    """Block-row count for the streaming kernel.

    - Byte-capped (~2 MiB) so double-buffered in+out stays <= ~8 MiB
      (fits v5e's 16 MiB scoped VMEM default; v6e/v7x have more headroom).
      Scaling by itemsize keeps bf16/fp8 blocks just as large in bytes.
    - For mid/large inputs, pick an EVEN number (>= 4) of near-equal steps:
      enough grid steps for the auto-pipeline to hide the HBM round trip,
      and balanced sharding across v7x's two TensorCores on the parallel axis.
    """
    max_rows = max(8, (_TARGET_BLOCK_BYTES // (_LANE * itemsize)) // 8 * 8)
    if rows <= _MIN_BLOCK_ROWS:
        return rows                                   # single full-extent block
    steps = max(4, 2 * pl.cdiv(pl.cdiv(rows, max_rows), 2))   # even, >= 4
    block = min(max_rows, ((pl.cdiv(rows, steps) + 7) // 8) * 8)
    return max(8, min(block, rows))


def _distance_jnp(x, alpha, beta):
    """Fused-XLA fallback: exactly the module formula with type_as semantics."""
    a = jnp.asarray(alpha, dtype=x.dtype)
    b = jnp.asarray(beta, dtype=x.dtype)
    return a * jnp.minimum(jnp.abs(x), b)


# ---------------------------------------------------------------------------
# Public entry points
# ---------------------------------------------------------------------------

def distance_forward(x, alpha, beta, *, donate=False, use_pallas=None,
                     block_rows=None):
    """Compute alpha * min(|x|, beta) elementwise.

    x:           any-shaped float array (e.g. NCHW activations / disparity diffs)
    alpha, beta: python floats or 0-d arrays (the module's nn.Parameters)
    donate:      alias x's buffer to the output (only meaningful on the Pallas
                 path, where the (rows, 128) reshape is zero-copy)
    use_pallas:  None = auto (Pallas only for large, 128-aligned sizes);
                 True/False to force.  Ragged sizes always take the fused-jnp
                 path -- a single HBM pass, with no pad/slice round trips.
    block_rows:  optional block-row override (testing / tuning).
    """
    n = x.size
    aligned = (n % _LANE == 0) and n > 0
    if use_pallas is None:
        use_pallas = aligned and n >= _MIN_PALLAS_ELEMS
    if not use_pallas or not aligned:
        return _distance_jnp(x, alpha, beta)

    orig_shape = x.shape
    orig_dtype = x.dtype
    rows = n // _LANE
    x2d = jnp.reshape(x, (rows, _LANE))          # zero-copy lane-dense slab
    itemsize = jnp.dtype(orig_dtype).itemsize

    if block_rows is None:
        block_rows = _pick_block_rows(rows, itemsize)
    else:
        block_rows = min(int(block_rows), rows)
        if block_rows != rows:
            block_rows = max(8, (block_rows // 8) * 8)   # sublane multiple

    # f32 scalars in SMEM regardless of x dtype; cast once inside the kernel.
    params = jnp.asarray([alpha, beta], dtype=jnp.float32)
    grid = (pl.cdiv(rows, block_rows),)
    cost = pl.CostEstimate(flops=3 * n, transcendentals=0,
                           bytes_accessed=2 * n * itemsize)

    out2d = pl.pallas_call(
        _distance_kernel,
        out_shape=jax.ShapeDtypeStruct((rows, _LANE), orig_dtype),
        grid_spec=pltpu.PrefetchScalarGridSpec(
            num_scalar_prefetch=0,
            grid=grid,
            in_specs=[
                pl.BlockSpec(memory_space=pltpu.SMEM),               # [alpha, beta]
                pl.BlockSpec((block_rows, _LANE), lambda i: (i, 0)),
            ],
            out_specs=pl.BlockSpec((block_rows, _LANE), lambda i: (i, 0)),
        ),
        compiler_params=pltpu.CompilerParams(
            dimension_semantics=("parallel",)),
        cost_estimate=cost,
        input_output_aliases=({1: 0} if donate else {}),
    )(params, x2d)

    return out2d.reshape(orig_shape)             # zero-copy reshape back


def create_distance_matrix(L, alpha, beta, *, dtype=jnp.float32):
    """Equivalent of Distance.create_distance_matrix: [1, L, L] with
    dist[0, i, l] = phi(i - l).  Write-only kernel, tiled in both dimensions
    with byte-capped blocks (<= 512 x 1024 f32 = 2 MiB) so it pipelines and
    fits scoped VMEM on v5e/v6e/v7x even for large L.  Pass dtype=jnp.bfloat16
    to halve output bytes if the consumer is bf16 (HBM-write-bound kernel)."""
    L = int(L)
    if L <= 0:
        return jnp.zeros((1, max(L, 0), max(L, 0)), dtype=dtype)

    params = jnp.asarray([alpha, beta], dtype=jnp.float32)
    bm = L if L <= 512 else 512            # multiple of 8 (or full extent)
    bn = L if L <= 1024 else 1024          # multiple of 128 (or full extent)
    grid = (pl.cdiv(L, bm), pl.cdiv(L, bn))

    out = pl.pallas_call(
        _distance_matrix_kernel,
        out_shape=jax.ShapeDtypeStruct((L, L), dtype),
        grid_spec=pltpu.PrefetchScalarGridSpec(
            num_scalar_prefetch=0,
            grid=grid,
            in_specs=[pl.BlockSpec(memory_space=pltpu.SMEM)],        # [alpha, beta]
            out_specs=pl.BlockSpec((bm, bn), lambda i, j: (i, j)),
        ),
        compiler_params=pltpu.CompilerParams(
            dimension_semantics=("parallel", "parallel")),
        cost_estimate=pl.CostEstimate(
            flops=5 * L * L, transcendentals=0,
            bytes_accessed=L * L * jnp.dtype(dtype).itemsize),
    )(params)
    return out[None, :, :]


# TODO(synk): parameters_constraint (in-place clamp of nn.Parameter data) is a
# training-time utility with no forward-pass equivalent; not implemented here.


if __name__ == "__main__":
    key = jax.random.PRNGKey(0)

    # Deterministic parameters matching the nn.Parameter defaults in __init__.
    alpha = 1.0
    beta = 4.0

    # 1) Small NCHW-like input (2*4*16*16 = 2048, multiple of 128).  Force the
    #    Pallas path with a small block so the grid has multiple steps.
    x = jax.random.normal(key, (2, 4, 16, 16), dtype=jnp.float32) * 10.0
    out = jax.block_until_ready(
        distance_forward(x, alpha, beta, use_pallas=True, block_rows=8))
    ref = alpha * jnp.minimum(jnp.abs(x), beta)
    assert out.shape == x.shape and out.dtype == x.dtype
    assert jnp.allclose(out, ref, atol=1e-6, rtol=1e-6)

    # 2) bf16 input: native bf16 compute in-kernel (matches torch type_as).
    xb = x.astype(jnp.bfloat16)
    outb = jax.block_until_ready(distance_forward(xb, alpha, beta, use_pallas=True))
    refb = _distance_jnp(xb, alpha, beta)
    assert outb.dtype == jnp.bfloat16
    assert jnp.allclose(outb.astype(jnp.float32), refb.astype(jnp.float32),
                        atol=1e-2, rtol=1e-2)

    # 3) Ragged total size (3*5*7 = 105): auto-dispatch takes the fused-jnp
    #    path -- no pad / slice HBM round trips, single pass.
    x2 = jax.random.normal(jax.random.PRNGKey(1), (3, 5, 7), dtype=jnp.float32) * 10.0
    out2 = jax.block_until_ready(distance_forward(x2, alpha, beta))
    ref2 = alpha * jnp.minimum(jnp.abs(x2), beta)
    assert out2.shape == x2.shape
    assert jnp.allclose(out2, ref2, atol=1e-6, rtol=1e-6)

    # 4) Distance-matrix constructor (L = 8): write-only kernel with fused iota.
    dmat = jax.block_until_ready(create_distance_matrix(8, alpha, beta))
    idx = jnp.arange(8, dtype=jnp.float32)
    dref = (alpha * jnp.minimum(jnp.abs(idx[:, None] - idx[None, :]), beta))[None]
    assert dmat.shape == (1, 8, 8)
    assert jnp.allclose(dmat, dref, atol=1e-6, rtol=1e-6)

    print("KERNEL_OK")
</pallas_src>

<mosaic_0001>
module attributes {stable_mosaic.version = 11 : i64} {
  func.func @_distance_kernel(%arg0: i32, %arg1: memref<2xf32, #tpu.memory_space<smem>>, %arg2: memref<8x128xf32, #tpu.memory_space<vmem>>, %arg3: memref<8x128xf32, #tpu.memory_space<vmem>>) attributes {dimension_semantics = [#tpu.dimension_semantics<parallel>], iteration_bounds = array<i64: 2>, scalar_prefetch = 0 : i64, scratch_operands = 0 : i64, tpu.core_type = #tpu.core_type<tc>, window_params = [{transform_indices = @transform_0, window_bounds = array<i64: 2>}, {transform_indices = @transform_1, window_bounds = array<i64: 8, 128>}, {transform_indices = @transform_2, window_bounds = array<i64: 8, 128>}]} {
    %c0 = arith.constant 0 : index
    %c0_0 = arith.constant 0 : index
    %0 = vector.load %arg2[%c0, %c0_0] : memref<8x128xf32, #tpu.memory_space<vmem>>, vector<8x128xf32>
    %c0_1 = arith.constant 0 : index
    %1 = memref.load %arg1[%c0_1] : memref<2xf32, #tpu.memory_space<smem>>
    %c1 = arith.constant 1 : index
    %2 = memref.load %arg1[%c1] : memref<2xf32, #tpu.memory_space<smem>>
    %3 = math.absf %0 : vector<8x128xf32>
    %4 = vector.broadcast %2 : f32 to vector<8x128xf32>
    %5 = arith.minimumf %3, %4 : vector<8x128xf32>
    %6 = vector.broadcast %1 : f32 to vector<8x128xf32>
    %7 = arith.mulf %6, %5 : vector<8x128xf32>
    %c0_2 = arith.constant 0 : index
    %c0_3 = arith.constant 0 : index
    %8 = vector.load %arg3[%c0_2, %c0_3] : memref<8x128xf32, #tpu.memory_space<vmem>>, vector<8x128xf32>
    tpu.vector_store %arg3[%c0_2, %c0_3], %7 {strides = array<i32>} : memref<8x128xf32, #tpu.memory_space<vmem>>, vector<8x128xf32>,
    return
  }
  func.func @transform_0(%arg0: i32) -> i32 {
    %c0_i32 = arith.constant 0 : i32
    %c0_i32_0 = arith.constant 0 : i32
    return %c0_i32 : i32
  }
  func.func @transform_1(%arg0: i32) -> (i32, i32) {
    %c0_i32 = arith.constant 0 : i32
    %c0_i32_0 = arith.constant 0 : i32
    return %arg0, %c0_i32 : i32, i32
  }
  func.func @transform_2(%arg0: i32) -> (i32, i32) {
    %c0_i32 = arith.constant 0 : i32
    %c0_i32_0 = arith.constant 0 : i32
    return %arg0, %c0_i32 : i32, i32
  }
}

</mosaic_0001>

<bundles_post_ra>
// kernel: tpu_custom_call.1
= control target key start
LH: loop header
LB: loop body
LE: loop exit
PB: predicated region body
PF: predicated region fallthrough
CT: control target
= control target key end

     0   :  { %7 = vsyncpa [#allocation5], 0  ;;  %s686_s0 = inlined_call_operand.hbm [shape: f32[2], index: 0, kind: input, shape index: {}]   ;;  %s687_s1 = inlined_call_operand.hbm [shape: f32[16,128], index: 1, kind: input, shape index: {}]   ;;  %s688_s2 = inlined_call_operand.hbm [shape: f32[16,128], index: 2, kind: output, shape index: {}]  }
   0x1   :  { %8 = vsyncpa [#allocation3], 0 }
   0x2   :  { %10 = vsyncpa [#allocation3 + $0x1], 0 }
   0x3   :  { %11 = vsyncpa [#allocation4], 0 }
   0x4   :  { %13 = vsyncpa [#allocation4 + $0x1], 0  ;;  %s481_s9 = smov 0   ;;  %s483_s10 = smov 0  }
   0x5   :  { %s485_s11 = smov 0   ;;  %s487_s12 = smov 0  }
   0x6 LB: > { %s502_s13 = sadd.s32 4294967295, %s461_s12   ;;  %s276_s14 = sadd.s32 4294967294, %s461_s12   ;;  %s461_s12 = sphi %s487_s12, %s709_s12   ;;  %s457_s11 = sphi %s485_s11, %s708_s11   ;;  %s453_s10 = sphi %s483_s10, %s707_s10   ;;  %s449_s9 = sphi %s481_s9, %s706_s9  }
   0x7   : > { %p60_p0 = scmp.ne.s32.totalorder %s453_s10, %s449_s9  ;;  %p689_p1 = scmp.eq.s32.totalorder %s502_s13, 0 }
   0x8   : > { %p90_p3 = scmp.eq.s32.totalorder %s276_s14, 1  ;;  %p277_p5 = scmp.ge.s32.totalorder %s461_s12, 1 }
   0x9   : > { %p511_p4 = por %p689_p1, %p60_p0  ;;  %p97_p7 = scmp.lt.s32.totalorder %s461_s12, 3 }
   0xa   : > { %p516_p6 = por %p90_p3, %p60_p0  ;;  %s527_s18 = sadd.s32 1, %s461_s12  }
   0xb   : > { %s692_s15 = scalar_select %p511_p4, 1, 0 }
   0xc   : > { %s693_s16 = scalar_select %p516_p6, 1, 0 }
   0xd   : > { %p521_p8 = pnand %p277_p5, %p97_p7  ;;  %s44_s19 = ssub.s32 %s461_s12, %s527_s18 }
   0xe   : > { %s47_s20 = sadd.s32 1, %s457_s11  ;;  %p540_p12 = scmp.eq.s32.totalorder %s44_s19, 0 }
   0xf   : > { %p299_p10 = pneg %p521_p8  ;;  %p54_p13 = scmp.ne.s32.totalorder %s457_s11, %s453_s10 }
  0x10   : > { %p55_p0 = scmp.eq.s32.totalorder %s461_s12, 0  ;;  %p312_p3 = scmp.lt.s32.totalorder %s461_s12, 2 }
  0x11   : > { %p536_p11 = pnand %p299_p10, %p689_p1  ;;  %s348_s25 = scalar_lea.hbm %s686_s0, 16 }
  0x12   : > { %p349_p5 = scmp.ne.s32.totalorder %s686_s0, %s348_s25  ;;  %p355_p1 = scmp.lt.u32.totalorder %s348_s25, %s686_s0 }
  0x13   : > { %p350_p7 = pneg %p536_p11 }
  0x15   : > { %p351_p10 = pnand %p350_p7, %p349_p5 }
  0x17   : > { %p352_p9 = pneg %p351_p10 }
  0x19   : > { %p357_p2 = pnand %p355_p1, %p352_p9 }
  0x1b   : > { %360 = shalt.err (!%p357_p2)
}
  0x1c   : > { %s463_s30 = smov [#allocation2]   ;;  %p56_p1 = por %p55_p0, %p54_p13 }
  0x1d   : > { %302 = dma.hbm_to_smem (!%p536_p11), %s686_s0, 16, %s463_s30, [#allocation5]  }
  0x1e   : > { %s567_s5 = scalar_select %p540_p12, %s457_s11, %s47_s20  }
  0x1f   : > { %p697_p2 = scmp.eq.s32.totalorder %s502_s13, 1  ;;  %s119_s7 = sand.u32 1, %s457_s11  }
  0x20   : > { %s281_s8 = sshll.u32 %s461_s12, 7  ;;  %s280_s14 = sshll.u32 %s119_s7, 3 }
  0x21   : > { %p579_p9 = por %p697_p2, %p54_p13  ;;  %s588_s23 = scalar_lea.hbm %s687_s1, %s281_s8 }
  0x22   : > { %s123_s20 = scalar_lea.vmem [#allocation6], %s280_s14  ;;  %p592_p11 = pnand %p312_p3, %p56_p1 }
  0x23   : > { %s698_s6 = scalar_select %p579_p9, 1, 0 }
  0x24   : > { %s130_s22 = sshll.u32 %s123_s20, 4  ;;  %s120_s25 = scalar_lea.sflag [#allocation3], %s119_s7  ;;  %s596_s22 = int_to_ptr.vmem [resolvable:$true] %s130_s22 }
  0x25   : > { %s361_s26 = scalar_lea.hbm %s588_s23, 128  ;;  %p363_p13 = pneg %p592_p11 }
  0x26   : > { %p362_p12 = scmp.ne.s32.totalorder %s588_s23, %s361_s26  ;;  %s366_s29 = scalar_lea.hbm %s687_s1, 256 }
  0x27   : > { %p367_p3 = scmp.lt.u32.totalorder %s588_s23, %s687_s1  ;;  %p368_p7 = scmp.lt.u32.totalorder %s366_s29, %s361_s26 }
  0x28   : > { %p364_p0 = pnand %p363_p13, %p362_p12  ;;  %p370_p1 = scmp.lt.u32.totalorder %s361_s26, %s588_s23 }
  0x29   : > { %p369_p10 = por %p368_p7, %p367_p3 }
  0x2a   : > { %p365_p5 = pneg %p364_p0 }
  0x2b   : > { %p371_p2 = por %p370_p1, %p369_p10 }
  0x2d   : > { %p372_p6 = pnand %p371_p2, %p365_p5 }
  0x2f   : > { %375 = shalt.err (!%p372_p6)
}
  0x30   : > { %s376_s4 = scalar_lea.vmem %s596_s22, 128  ;;  %s464_s7 = smov [#allocation6]  }
  0x31   : > { %p377_p12 = scmp.ne.s32.totalorder %s596_s22, %s376_s4  ;;  %s381_s8 = sshll.u32 %s464_s7, 4  ;;  %s382_s8 = int_to_ptr.vmem [resolvable:$false] %s381_s8 }
  0x32   : > { %s383_s14 = scalar_lea.vmem %s382_s8, 256  ;;  %p384_p4 = scmp.lt.s32.totalorder %s596_s22, %s382_s8 }
  0x33   : > { %p379_p0 = pnand %p377_p12, %p363_p13  ;;  %p385_p3 = scmp.lt.s32.totalorder %s383_s14, %s376_s4 }
  0x35   : > { %p380_p9 = pneg %p379_p0  ;;  %p386_p7 = por %p385_p3, %p384_p4 }
  0x37   : > { %p387_p10 = pnand %p386_p7, %p380_p9 }
  0x39   : > { %390 = shalt.err (!%p387_p10)
}
  0x3a   : > { %306 = dma.hbm_to_vmem [thread:$0]  (!%p592_p11), %s588_s23, 128, %s596_s22, %s120_s25  }
  0x3b   : > { %139 = sbr.rel (%p521_p8) target bundleno = 100 (0x64), region = 28  ;;  %p700_p6 = scmp.eq.s32.totalorder (!%p521_p8), %s502_s13, 0 }
  0x42   : > { %436 = dma.done.wait (%p700_p6), [#allocation5], 16   ;;  %p701_p13 = pmov %p700_p6 }
  0x43   : > { %s630_s19 = sand.u32 1, %s453_s10   ;;  %p702_p4 = scmp.ne.s32.totalorder %s692_s15, 0 }
  0x44   : > { %438 = vsyncadd (%p701_p13), [#allocation5], 4294967280  ;;  %s284_s21 = sshll.u32 %s630_s19, 3  ;;  %s146_s20 = scalar_lea.sflag [#allocation3], %s630_s19 }
  0x45   : > { %s149_s24 = scalar_lea.vmem [#allocation6], %s284_s21 }
  0x46   : > { %440 = dma.done.wait (%p702_p4), %s146_s20, 128  }
  0x47   : > { %442 = vsyncadd (%p702_p4), %s146_s20, 4294967168 }
  0x48   : > { %154 = sfence }
  0x49   : > { %s172_s17 = sld [smem:[#allocation2]]  ;;  %v171_v0 = vld [vmem:[%s149_s24] sm:$0xff]  ;;  %s286_s23 = sld [smem:[#allocation2 + $0x1]] }
  0x4a   : > { %v174_v1 = vand.u32 2147483647, %v171_v0  ;;  %s170_s22 = scalar_lea.vmem [#allocation7], %s284_s21  ;;  %s288_s26 = sshll.u32 %s502_s13, 7 }
  0x4b   : > { %s194_s25 = sshll.u32 %s170_s22, 4  ;;  %s644_s28 = scalar_lea.hbm %s688_s2, %s288_s26  ;;  %s639_s25 = int_to_ptr.vmem [resolvable:$true] %s194_s25 }
  0x4c   : > { %s181_s29 = scalar_lea.sflag [#allocation4], %s630_s19  ;;  %s391_s30 = scalar_lea.vmem %s639_s25, 128 }
  0x4d   : > { %p392_p8 = scmp.ne.s32.totalorder %s639_s25, %s391_s30  ;;  %p703_p9 = scmp.ne.s32.totalorder %s698_s6, 0 }
  0x4e   : > { %s465_s13 = smov [#allocation7]  }
  0x4f   : > { %v175_v2 = vstv %s286_s23  ;;  %v177_v3 = vstv %s172_s17  ;;  %p393_p11 = pnand %p392_p8, %p703_p9  ;;  %s395_s3 = sshll.u32 %s465_s13, 4  ;;  %s396_s3 = int_to_ptr.vmem [resolvable:$false] %s395_s3 }
  0x50   : > { %v176_v4 = vmin.f32 %v174_v1, %v175_v2  ;;  %s397_s4 = scalar_lea.vmem %s396_s3, 256  ;;  %p398_p1 = scmp.lt.s32.totalorder %s639_s25, %s396_s3 }
  0x51   : > { %p394_p5 = pneg %p393_p11  ;;  %p399_p2 = scmp.lt.s32.totalorder %s397_s4, %s391_s30 }
  0x52   : > { %v178_v5 = vmul.f32 %v177_v3, %v176_v4 }
  0x53   : > { %p400_p12 = por %p399_p2, %p398_p1 }
  0x54   : > { %179 = vst [vmem:[%s170_s22] sm:$0xff] %v178_v5 }
  0x55   : > { %p401_p0 = pnand %p400_p12, %p394_p5 }
  0x57   : > { %404 = shalt.err (!%p401_p0)
}
  0x58   : > { %s405_s7 = scalar_lea.hbm %s644_s28, 128  ;;  %s409_s19 = scalar_lea.hbm %s688_s2, 256 }
  0x59   : > { %p406_p3 = scmp.ne.s32.totalorder %s644_s28, %s405_s7  ;;  %p410_p6 = scmp.lt.u32.totalorder %s644_s28, %s688_s2 }
  0x5a   : > { %p411_p13 = scmp.lt.u32.totalorder %s409_s19, %s405_s7  ;;  %p413_p8 = scmp.lt.u32.totalorder %s405_s7, %s644_s28 }
  0x5b   : > { %p407_p7 = pnand %p406_p3, %p703_p9 }
  0x5c   : > { %p412_p4 = por %p411_p13, %p410_p6 }
  0x5d   : > { %p408_p10 = pneg %p407_p7 }
  0x5e   : > { %p414_p11 = por %p413_p8, %p412_p4 }
  0x60   : > { %p415_p5 = pnand %p414_p11, %p408_p10 }
  0x62   : > { %418 = shalt.err (!%p415_p5)
}
  0x63   : > { %297 = dma.vmem_to_hbm [thread:$0]  (%p703_p9), %s639_s25, 128, %s644_s28, %s181_s29  }
  0x64 PF: > { %s206_s24 = sand.u32 1, %s449_s9   ;;  %p704_p1 = scmp.ne.s32.totalorder %s693_s16, 0 }
  0x65   : > { %p705_p2 = scmp.ge.s32.totalorder %s461_s12, 2  ;;  %s207_s17 = scalar_lea.sflag [#allocation4], %s206_s24 }
  0x67   : > { %p308_p12 = pnand %p705_p2, %p704_p1 }
  0x69   : > { %444 = dma.done.wait (!%p308_p12), %s207_s17, 128  }
  0x6a   : > { %446 = vsyncadd (!%p308_p12), %s207_s17, 4294967168  ;;  %p16_p0 = scmp.ge.s32.totalorder %s527_s18, 4   ;;  %s706_s9 = smov %s453_s10 }
  0x6b   : > { %s707_s10 = smov %s457_s11  ;;  %s708_s11 = smov %s567_s5 }
  0x6c   : > { %s709_s12 = smov %s527_s18  ;;  %18 = sbr.rel (!%p16_p0) target bundleno = 6 (0x6), region = 78 }
  0x73   :  { %212 = vsyncpa [#allocation3], 1 }
  0x74   :  { %214 = vsyncpa [#allocation3 + $0x1], 1 }
  0x75   :  { %215 = vsyncpa [#allocation4], 1 }
  0x76   :  { %217 = vsyncpa [#allocation4 + $0x1], 1 }
  0x77   :  { %218 = vsyncpa [#allocation5], 1 }
  0x78   :  { %220 = vsyncpa [#allocation5 + $0x1], 1 }

</bundles_post_ra>
